<compile_context>
chip_gen: v7x
topology: tpu7x:2x2x1
jax: 0.10.0
libtpu: 0.0.40
codegen_flags: <defaults>
</compile_context>

<pallas_src>
import functools

import jax
import jax.numpy as jnp
from jax.experimental import pallas as pl
from jax.experimental.pallas import tpu as pltpu

_LANE = 128


def _round_up(x, m):
    return (x + m - 1) // m * m


def _vmem_capacity_bytes():
    try:
        info = pltpu.get_tpu_info()
        cap = getattr(info, "vmem_capacity_bytes", None)
        if cap:
            return int(cap)
    except Exception:
        pass
    return 64 * 1024 * 1024  # conservative default (v7x per-TC VMEM)


def _select_tile_and_vmem(batch, per_row_x_bytes, out_lanes, n_stats, v_pad,
                          resident_bytes):
    """Pick the batch tile and an explicit vmem_limit_bytes for CompilerParams."""
    cap = _vmem_capacity_bytes()
    budget = int(cap * 0.45)  # headroom for compiler scratch / semaphores

    def need(tb):
        return (2 * tb * per_row_x_bytes          # double-buffered x tile (bf16)
                + 2 * tb * out_lanes * 4          # double-buffered output tile
                + n_stats * tb * v_pad * 4        # accumulator scratch (f32)
                + resident_bytes)                 # weights + bias (double-buffered)

    cands = sorted({batch} | {t for t in (8, 16, 32, 64, 128, 256, 512, 1024)
                              if t < batch})
    fitting = [t for t in cands if need(t) <= budget]
    if not fitting:
        fitting = [min(cands)]  # smallest tile; huge images simply get tiny tiles
    if batch >= 16:
        # Keep >= 2 batch tiles so the "parallel" axis can use both TCs on v7x.
        multi = [t for t in fitting if pl.cdiv(batch, t) >= 2]
        if multi:
            fitting = multi
    tile_b = max(fitting)
    vmem_limit = min(int(cap * 0.9), max(need(tile_b) + (8 << 20), 32 << 20))
    return tile_b, vmem_limit


def _fused_pool_embed_kernel(x_ref, w_ref, b_ref, o_ref, *stats,
                             methods, n_images, v_pad, stat_idx):
    # x_ref: (tile_b, C, HW) bf16   w_ref: (C, V_pad) bf16   b_ref: (1, V_pad) f32
    # o_ref: (tile_b, len(methods) * V_pad) f32    stats: VMEM (tile_b, V_pad) f32
    n = pl.program_id(1)

    # Global average pool over H*W (lane reduction, f32 accumulate) then a tiny
    # (C x V_pad) bf16 MXU contraction with f32 accumulation.
    pooled = jnp.mean(x_ref[...].astype(jnp.float32), axis=-1)        # (tile_b, C)
    emb = jnp.dot(pooled.astype(jnp.bfloat16), w_ref[...],
                  preferred_element_type=jnp.float32)                  # (tile_b, V_pad)

    @pl.when(n == 0)
    def _init():
        if "max" in stat_idx:
            stats[stat_idx["max"]][...] = emb
        if "min" in stat_idx:
            stats[stat_idx["min"]][...] = emb
        if "ref0" in stat_idx:
            stats[stat_idx["ref0"]][...] = emb
        if "sum" in stat_idx:
            stats[stat_idx["sum"]][...] = jnp.zeros_like(emb)
        if "sumsq" in stat_idx:
            stats[stat_idx["sumsq"]][...] = jnp.zeros_like(emb)

    @pl.when(n > 0)
    def _update():
        if "max" in stat_idx:
            r = stats[stat_idx["max"]]
            r[...] = jnp.maximum(r[...], emb)
        if "min" in stat_idx:
            r = stats[stat_idx["min"]]
            r[...] = jnp.minimum(r[...], emb)
        if "sum" in stat_idx:
            # Shifted accumulation around the first image's embedding: avoids
            # E[x^2]-E[x]^2 catastrophic cancellation in the std finalize.
            d = emb - stats[stat_idx["ref0"]][...]
            stats[stat_idx["sum"]][...] += d
            if "sumsq" in stat_idx:
                stats[stat_idx["sumsq"]][...] += d * d

    @pl.when(n == n_images - 1)
    def _finalize():
        bias = b_ref[...]  # bias folded here: max/min/mean commute, std invariant
        inv_n = 1.0 / n_images
        # Matches torch.std(dim=1) (unbiased, ddof=1): NaN when n_images == 1.
        inv_nm1 = (1.0 / (n_images - 1)) if n_images > 1 else float("nan")
        for i, m in enumerate(methods):
            if m == "max":
                r = stats[stat_idx["max"]][...] + bias
            elif m == "min":
                r = stats[stat_idx["min"]][...] + bias
            elif m == "mean":
                r = (stats[stat_idx["ref0"]][...]
                     + stats[stat_idx["sum"]][...] * inv_n + bias)
            elif m == "std":
                s = stats[stat_idx["sum"]][...]
                sq = stats[stat_idx["sumsq"]][...]
                var = (sq - s * s * inv_n) * inv_nm1
                r = jnp.sqrt(jnp.maximum(var, 0.0))
            else:  # pragma: no cover (validated in the wrapper)
                raise NotImplementedError(m)
            # Lane-dense store: each slice is V_pad (multiple of 128) wide.
            o_ref[:, i * v_pad:(i + 1) * v_pad] = r


def _embed_concat_kernel(x_ref, w_ref, b_ref, o_ref):
    # concat pooling: per-image embeddings, one lane-dense block per (b, n).
    pooled = jnp.mean(x_ref[...].astype(jnp.float32), axis=-1)
    o_ref[...] = (jnp.dot(pooled.astype(jnp.bfloat16), w_ref[...],
                          preferred_element_type=jnp.float32) + b_ref[...])


def place_embedding_base(x, w, b, *, pooling="max"):
    """x: (batch, n_images, C, H, W) (NCHW per image, like PyTorch)."""
    batch, n_images, c, h, ww = x.shape
    vec_size = w.shape[1]
    hw = h * ww
    v_pad = _round_up(max(vec_size, _LANE), _LANE)

    # ---- wrapper-side layout prep (plain JAX glue, no padding copies of x) ----
    # bf16 halves the dominant x HBM read inside the kernel.  If the caller
    # already supplies bf16 images this is a no-op.
    if x.dtype != jnp.bfloat16:
        x = x.astype(jnp.bfloat16)
    x4 = x.reshape(batch, n_images, c, hw)            # contiguous reshape (free)

    w_p = jnp.pad(w.astype(jnp.float32),
                  ((0, 0), (0, v_pad - vec_size))).astype(jnp.bfloat16)   # (C, V_pad)
    b_p = jnp.pad(jnp.reshape(b, (1, vec_size)).astype(jnp.float32),
                  ((0, 0), (0, v_pad - vec_size)))                        # (1, V_pad)

    per_row_x_bytes = c * hw * 2                       # one batch row of one image, bf16
    resident = 2 * (c * v_pad * 2) + 2 * (v_pad * 4)   # weights + bias, double-buffered

    # x block: (tile_b, squeezed image, full C, full HW) -> full-dim escape of the
    # (8,128) rule on the last two dims; no padding of x needed.
    def make_x_spec(tile_b):
        return pl.BlockSpec((tile_b, None, c, hw), lambda bi, ni: (bi, ni, 0, 0))

    w_spec = pl.BlockSpec((c, v_pad), lambda bi, ni: (0, 0))
    b_spec = pl.BlockSpec((1, v_pad), lambda bi, ni: (0, 0))

    pool_flops = batch * n_images * c * hw             # H*W reduction adds
    matmul_flops = 2 * batch * n_images * c * v_pad
    x_bytes = 2 * batch * n_images * c * hw            # bf16

    if pooling == "concat":
        tile_b, vmem_limit = _select_tile_and_vmem(
            batch, per_row_x_bytes, v_pad, 0, v_pad, resident)
        grid = (pl.cdiv(batch, tile_b), n_images)
        out = pl.pallas_call(
            _embed_concat_kernel,
            grid=grid,
            in_specs=[make_x_spec(tile_b), w_spec, b_spec],
            out_specs=pl.BlockSpec((tile_b, v_pad), lambda bi, ni: (bi, ni)),
            out_shape=jax.ShapeDtypeStruct((batch, n_images * v_pad), jnp.float32),
            compiler_params=pltpu.CompilerParams(
                dimension_semantics=("parallel", "parallel"),
                vmem_limit_bytes=vmem_limit),
            cost_estimate=pl.CostEstimate(
                flops=pool_flops + matmul_flops,
                transcendentals=0,
                bytes_accessed=x_bytes + 4 * batch * n_images * v_pad
                + 2 * c * v_pad),
        )(x4, w_p, b_p)
        out = out.reshape(batch, n_images, v_pad)[:, :, :vec_size]
        return out.reshape(batch, n_images * vec_size)

    methods = tuple(pooling.split("-"))
    for m in methods:
        if m not in ("max", "min", "mean", "std"):
            # TODO(synk): 'median' pooling needs a per-lane sort over n_images;
            # no clean Pallas TPU lowering here.
            raise NotImplementedError(f"pooling method {m!r} not supported")

    # Running statistics carried across the n_images (reduction) grid axis.
    stat_names = []
    if "max" in methods:
        stat_names.append("max")
    if "min" in methods:
        stat_names.append("min")
    if ("mean" in methods) or ("std" in methods):
        stat_names += ["ref0", "sum"]                 # shifted-sum accumulation
    if "std" in methods:
        stat_names.append("sumsq")
    stat_idx = {nm: i for i, nm in enumerate(stat_names)}

    out_dim = len(methods) * v_pad
    tile_b, vmem_limit = _select_tile_and_vmem(
        batch, per_row_x_bytes, out_dim, len(stat_names), v_pad, resident)
    grid = (pl.cdiv(batch, tile_b), n_images)

    kernel = functools.partial(
        _fused_pool_embed_kernel,
        methods=methods, n_images=n_images, v_pad=v_pad, stat_idx=stat_idx)

    out = pl.pallas_call(
        kernel,
        grid=grid,
        in_specs=[make_x_spec(tile_b), w_spec, b_spec],
        out_specs=pl.BlockSpec((tile_b, out_dim), lambda bi, ni: (bi, 0)),
        out_shape=jax.ShapeDtypeStruct((batch, out_dim), jnp.float32),
        scratch_shapes=[pltpu.VMEM((tile_b, v_pad), jnp.float32)
                        for _ in stat_names],
        compiler_params=pltpu.CompilerParams(
            dimension_semantics=("parallel", "arbitrary"),
            vmem_limit_bytes=vmem_limit),
        cost_estimate=pl.CostEstimate(
            flops=pool_flops + matmul_flops,
            transcendentals=0,
            bytes_accessed=x_bytes + 4 * batch * out_dim + 2 * c * v_pad),
    )(x4, w_p, b_p)

    out = out.reshape(batch, len(methods), v_pad)[:, :, :vec_size]
    return out.reshape(batch, len(methods) * vec_size)


def _reference(x, w, b, *, pooling="max"):
    batch, n_images, c, h, ww = x.shape
    pooled = jnp.mean(x.astype(jnp.float32).reshape(batch * n_images, c, h * ww),
                      axis=-1)
    emb = (pooled @ w + b).reshape(batch, n_images, -1)
    if pooling == "concat":
        return emb.reshape(batch, -1)
    parts = []
    for m in pooling.split("-"):
        if m == "mean":
            parts.append(jnp.mean(emb, axis=1))
        elif m == "std":
            parts.append(jnp.std(emb, axis=1, ddof=1))
        elif m == "max":
            parts.append(jnp.max(emb, axis=1))
        elif m == "min":
            parts.append(jnp.min(emb, axis=1))
    return jnp.concatenate(parts, axis=1)


if __name__ == "__main__":
    key = jax.random.PRNGKey(0)
    batch, n_images, c, h, w_sp = 2, 5, 4, 16, 16
    vec_size = 32

    kx, kw, kb = jax.random.split(key, 3)
    x = jax.random.normal(kx, (batch, n_images, c, h, w_sp), dtype=jnp.float32)
    W = 0.1 * jax.random.normal(kw, (c, vec_size), dtype=jnp.float32)
    b = 0.01 * jax.random.normal(kb, (1, vec_size), dtype=jnp.float32)

    # bf16 input path -> compare against f32 reference at bf16-appropriate tolerances.
    ATOL, RTOL = 3e-3, 2e-2

    # Module default pooling='max'.
    out = jax.block_until_ready(place_embedding_base(x, W, b, pooling="max"))
    assert out.shape == (batch, vec_size), out.shape
    ref = _reference(x, W, b, pooling="max")
    assert jnp.allclose(out, ref, atol=ATOL, rtol=RTOL), \
        float(jnp.max(jnp.abs(out - ref)))

    # Multi-statistic pooling exercises the fused single-pass accumulators.
    out_ms = jax.block_until_ready(
        place_embedding_base(x, W, b, pooling="mean-std-min-max"))
    ref_ms = _reference(x, W, b, pooling="mean-std-min-max")
    assert out_ms.shape == (batch, 4 * vec_size), out_ms.shape
    assert jnp.allclose(out_ms, ref_ms, atol=ATOL, rtol=RTOL), \
        float(jnp.max(jnp.abs(out_ms - ref_ms)))

    # Concat path (pure per-image embeddings).
    out_cc = jax.block_until_ready(place_embedding_base(x, W, b, pooling="concat"))
    ref_cc = _reference(x, W, b, pooling="concat")
    assert out_cc.shape == (batch, n_images * vec_size), out_cc.shape
    assert jnp.allclose(out_cc, ref_cc, atol=ATOL, rtol=RTOL)

    print("KERNEL_OK")
</pallas_src>

<mosaic_0001>
module attributes {stable_mosaic.version = 11 : i64} {
  func.func @_fused_pool_embed_kernel(%arg0: i32, %arg1: i32, %arg2: memref<2x1x4x256xbf16, #tpu.memory_space<vmem>>, %arg3: memref<4x128xbf16, #tpu.memory_space<vmem>>, %arg4: memref<1x128xf32, #tpu.memory_space<vmem>>, %arg5: memref<2x128xf32, #tpu.memory_space<vmem>>, %arg6: memref<2x128xf32, #tpu.memory_space<vmem>>) attributes {dimension_semantics = [#tpu.dimension_semantics<parallel>, #tpu.dimension_semantics<arbitrary>], iteration_bounds = array<i64: 1, 5>, scalar_prefetch = 0 : i64, scratch_operands = 1 : i64, tpu.core_type = #tpu.core_type<tc>, window_params = [{transform_indices = @transform_0, window_bounds = array<i64: 2, 1, 4, 256>}, {pipeline_mode = #tpu.pipeline_mode<synchronous>, transform_indices = @transform_1, window_bounds = array<i64: 4, 128>}, {pipeline_mode = #tpu.pipeline_mode<synchronous>, transform_indices = @transform_2, window_bounds = array<i64: 1, 128>}, {transform_indices = @transform_3, window_bounds = array<i64: 2, 128>}]} {
    %c0 = arith.constant 0 : index
    %c0_0 = arith.constant 0 : index
    %c0_1 = arith.constant 0 : index
    %c0_2 = arith.constant 0 : index
    %0 = vector.load %arg2[%c0, %c0_0, %c0_1, %c0_2] : memref<2x1x4x256xbf16, #tpu.memory_space<vmem>>, vector<2x1x4x256xbf16>
    %1 = vector.shape_cast %0 : vector<2x1x4x256xbf16> to vector<2x4x256xbf16>
    %2 = arith.extf %1 : vector<2x4x256xbf16> to vector<2x4x256xf32>
    %cst = arith.constant dense<0.000000e+00> : vector<2x4xf32>
    %3 = vector.multi_reduction <add>, %2, %cst [2] : vector<2x4x256xf32> to vector<2x4xf32>
    %cst_3 = arith.constant 2.560000e+02 : f32
    %4 = vector.broadcast %cst_3 : f32 to vector<2x4xf32>
    %5 = arith.divf %3, %4 : vector<2x4xf32>
    %6 = arith.truncf %5 : vector<2x4xf32> to vector<2x4xbf16>
    %c0_4 = arith.constant 0 : index
    %c0_5 = arith.constant 0 : index
    %7 = vector.load %arg3[%c0_4, %c0_5] : memref<4x128xbf16, #tpu.memory_space<vmem>>, vector<4x128xbf16>
    %cst_6 = arith.constant dense<0.000000e+00> : vector<2x128xf32>
    %8 = tpu.matmul %6, %7, %cst_6 {dimension_numbers = #tpu.dot_dimension_numbers<[1], [0], [0], [1], [0, 0, 1, 1], [], []>} : vector<2x4xbf16>, vector<4x128xbf16>, vector<2x128xf32> -> vector<2x128xf32>
    %c0_i32 = arith.constant 0 : i32
    %9 = arith.cmpi eq, %arg1, %c0_i32 : i32
    %10 = arith.extui %9 : i1 to i32
    %c0_i32_7 = arith.constant 0 : i32
    %11 = arith.cmpi ne, %10, %c0_i32_7 : i32
    scf.if %11 {
      %c0_11 = arith.constant 0 : index
      %c0_12 = arith.constant 0 : index
      %18 = vector.load %arg6[%c0_11, %c0_12] : memref<2x128xf32, #tpu.memory_space<vmem>>, vector<2x128xf32>
      tpu.vector_store %arg6[%c0_11, %c0_12], %8 {strides = array<i32>} : memref<2x128xf32, #tpu.memory_space<vmem>>, vector<2x128xf32>,
    } else {
    }
    %c0_i32_8 = arith.constant 0 : i32
    %12 = arith.cmpi sgt, %arg1, %c0_i32_8 : i32
    %13 = arith.extui %12 : i1 to i32
    %c0_i32_9 = arith.constant 0 : i32
    %14 = arith.cmpi ne, %13, %c0_i32_9 : i32
    scf.if %14 {
      %c0_11 = arith.constant 0 : index
      %c0_12 = arith.constant 0 : index
      %18 = vector.load %arg6[%c0_11, %c0_12] : memref<2x128xf32, #tpu.memory_space<vmem>>, vector<2x128xf32>
      %19 = arith.maximumf %18, %8 : vector<2x128xf32>
      %c0_13 = arith.constant 0 : index
      %c0_14 = arith.constant 0 : index
      %20 = vector.load %arg6[%c0_13, %c0_14] : memref<2x128xf32, #tpu.memory_space<vmem>>, vector<2x128xf32>
      tpu.vector_store %arg6[%c0_13, %c0_14], %19 {strides = array<i32>} : memref<2x128xf32, #tpu.memory_space<vmem>>, vector<2x128xf32>,
    } else {
    }
    %c4_i32 = arith.constant 4 : i32
    %15 = arith.cmpi eq, %arg1, %c4_i32 : i32
    %16 = arith.extui %15 : i1 to i32
    %c0_i32_10 = arith.constant 0 : i32
    %17 = arith.cmpi ne, %16, %c0_i32_10 : i32
    scf.if %17 {
      %c0_11 = arith.constant 0 : index
      %c0_12 = arith.constant 0 : index
      %18 = vector.load %arg4[%c0_11, %c0_12] : memref<1x128xf32, #tpu.memory_space<vmem>>, vector<1x128xf32>
      %c0_13 = arith.constant 0 : index
      %c0_14 = arith.constant 0 : index
      %19 = vector.load %arg6[%c0_13, %c0_14] : memref<2x128xf32, #tpu.memory_space<vmem>>, vector<2x128xf32>
      %20 = vector.broadcast %18 : vector<1x128xf32> to vector<2x128xf32>
      %21 = arith.addf %19, %20 : vector<2x128xf32>
      %c0_15 = arith.constant 0 : index
      %c0_16 = arith.constant 0 : index
      %22 = vector.load %arg5[%c0_15, %c0_16] : memref<2x128xf32, #tpu.memory_space<vmem>>, vector<2x128xf32>
      tpu.vector_store %arg5[%c0_15, %c0_16], %21 {strides = array<i32>} : memref<2x128xf32, #tpu.memory_space<vmem>>, vector<2x128xf32>,
    } else {
    }
    return
  }
  func.func @transform_0(%arg0: i32, %arg1: i32) -> (i32, i32, i32, i32) {
    %c0_i32 = arith.constant 0 : i32
    %c0_i32_0 = arith.constant 0 : i32
    %c0_i32_1 = arith.constant 0 : i32
    return %arg0, %arg1, %c0_i32, %c0_i32_0 : i32, i32, i32, i32
  }
  func.func @transform_1(%arg0: i32, %arg1: i32) -> (i32, i32) {
    %c0_i32 = arith.constant 0 : i32
    %c0_i32_0 = arith.constant 0 : i32
    %c0_i32_1 = arith.constant 0 : i32
    return %c0_i32, %c0_i32_0 : i32, i32
  }
  func.func @transform_2(%arg0: i32, %arg1: i32) -> (i32, i32) {
    %c0_i32 = arith.constant 0 : i32
    %c0_i32_0 = arith.constant 0 : i32
    %c0_i32_1 = arith.constant 0 : i32
    return %c0_i32, %c0_i32_0 : i32, i32
  }
  func.func @transform_3(%arg0: i32, %arg1: i32) -> (i32, i32) {
    %c0_i32 = arith.constant 0 : i32
    %c0_i32_0 = arith.constant 0 : i32
    return %arg0, %c0_i32 : i32, i32
  }
}

</mosaic_0001>

<bundles_post_ra>
// kernel: tpu_custom_call.1
= control target key start
LH: loop header
LB: loop body
LE: loop exit
PB: predicated region body
PF: predicated region fallthrough
CT: control target
= control target key end

     0   :  { %8 = vsyncpa [#allocation4], 0  ;;  %s788_s0 = inlined_call_operand.hbm [shape: bf16[2,5,4,256], index: 0, kind: input, shape index: {}]   ;;  %s789_s1 = inlined_call_operand.vmem [shape: bf16[4,128], index: 1, kind: input, shape index: {}]   ;;  %s790_s2 = inlined_call_operand.vmem [shape: f32[1,128], index: 2, kind: input, shape index: {}]   ;;  %s791_s3 = inlined_call_operand.hbm [shape: f32[2,128], index: 3, kind: output, shape index: {}]  }
   0x1   :  { %10 = vsyncpa [#allocation4 + $0x1], 0 }
   0x2   :  { %11 = vsyncpa [#allocation5], 0  ;;  %s628_s12 = smov 0   ;;  %s630_s13 = smov 0  }
   0x3   :  { %s632_s14 = smov 0   ;;  %s634_s15 = smov 0  }
   0x4   :  { %s636_s16 = smov 0   ;;  %s638_s17 = smov 0  }
   0x5 LB: > { %s392_s18 = sadd.s32 4294967295, %s599_s17   ;;  %s26_s19 = sadd.s32 1, %s595_s16  ;;  %s599_s17 = sphi %s638_s17, %s17_s17   ;;  %s595_s16 = sphi %s636_s16, %s801_s16   ;;  %s591_s15 = sphi %s634_s15, %s800_s15   ;;  %s587_s14 = sphi %s632_s14, %s799_s14   ;;  %s583_s13 = sphi %s630_s13, %s798_s13   ;;  %s579_s12 = sphi %s628_s12, %s797_s12  }
   0x6   : > { %p27_p0 = scmp.ge.s32.totalorder %s26_s19, 5  ;;  %s38_s20 = sadd.s32 1, %s587_s14 }
   0x7   : > { %p45_p1 = scmp.ne.s32.totalorder %s587_s14, %s583_s13  ;;  %p46_p2 = scmp.eq.s32.totalorder %s599_s17, 0 }
   0x8   : > { %s803_s19 = smov (%p27_p0, %s26_s19), 0  ;;  %p51_p4 = scmp.ne.s32.totalorder %s583_s13, %s579_s12 }
   0x9   : > { %p664_p3 = por %p46_p2, %p45_p1  ;;  %s34_s22 = ssub.s32 %s595_s16, %s803_s19 }
   0xa   : > { %p52_p5 = scmp.eq.s32.totalorder %s392_s18, 0  ;;  %p36_p6 = scmp.eq.s32.totalorder %s34_s22, 0 }
   0xb   : > { %p432_p8 = scmp.lt.s32.totalorder %s599_s17, 5  ;;  %s149_s25 = sand.u32 1, %s587_s14  }
   0xc   : > { %p673_p7 = por %p52_p5, %p51_p4  ;;  %s409_s26 = sshll.u32 %s595_s16, 6 }
   0xd   : > { %s679_s24 = scalar_select %p36_p6, %s587_s14, %s38_s20  }
   0xe   : > { %s395_s27 = sshll.u32 %s149_s25, 3  ;;  %s686_s30 = scalar_lea.hbm %s788_s0, %s409_s26 }
   0xf   : > { %s153_s4 = scalar_lea.vmem [#allocation3], %s395_s27  ;;  %p690_p9 = pnand %p432_p8, %p664_p3 }
  0x10   : > { %s163_s5 = sshll.u32 %s153_s4, 4  ;;  %s697_s7 = scalar_lea.sflag [#allocation4], %s149_s25  ;;  %s694_s5 = int_to_ptr.vmem [resolvable:$true] %s163_s5 }
  0x11   : > { %s489_s8 = scalar_lea.hbm %s686_s30, 128  ;;  %p491_p12 = pneg %p690_p9 }
  0x12   : > { %p490_p11 = scmp.ne.s32.totalorder %s686_s30, %s489_s8  ;;  %s494_s11 = scalar_lea.hbm %s788_s0, 640 }
  0x13   : > { %p495_p1 = scmp.lt.u32.totalorder %s686_s30, %s788_s0  ;;  %p496_p2 = scmp.lt.u32.totalorder %s494_s11, %s489_s8 }
  0x14   : > { %p492_p13 = pnand %p491_p12, %p490_p11  ;;  %p498_p4 = scmp.lt.u32.totalorder %s489_s8, %s686_s30 }
  0x15   : > { %p497_p3 = por %p496_p2, %p495_p1 }
  0x16   : > { %p493_p0 = pneg %p492_p13 }
  0x17   : > { %p499_p5 = por %p498_p4, %p497_p3 }
  0x19   : > { %p500_p6 = pnand %p499_p5, %p493_p0 }
  0x1b   : > { %503 = shalt.err (!%p500_p6)
}
  0x1c   : > { %s504_s21 = scalar_lea.vmem %s694_s5, 128  ;;  %s601_s22 = smov [#allocation3]  }
  0x1d   : > { %p505_p8 = scmp.ne.s32.totalorder %s694_s5, %s504_s21  ;;  %s509_s25 = sshll.u32 %s601_s22, 4  ;;  %s510_s25 = int_to_ptr.vmem [resolvable:$false] %s509_s25 }
  0x1e   : > { %s511_s26 = scalar_lea.vmem %s510_s25, 256  ;;  %p512_p10 = scmp.lt.s32.totalorder %s694_s5, %s510_s25 }
  0x1f   : > { %p507_p11 = pnand %p505_p8, %p491_p12  ;;  %p513_p1 = scmp.lt.s32.totalorder %s511_s26, %s504_s21 }
  0x21   : > { %p508_p13 = pneg %p507_p11  ;;  %p514_p2 = por %p513_p1, %p512_p10 }
  0x23   : > { %p515_p3 = pnand %p514_p2, %p508_p13 }
  0x25   : > { %518 = shalt.err (!%p515_p3)
}
  0x26   : > { %s602_s27 = smov 320   ;;  %s603_s28 = smov 64  }
  0x27   : > { %s604_s29 = smov 4   ;;  %p171_p12 = scmp.lt.s32.totalorder %s599_s17, 6 }
  0x28   : > { %431 = dma.hbm_to_vmem [thread:$0]  (!%p690_p9), %s686_s30, 128, %s694_s5, %s697_s7, %s602_s27, %s603_s28, %s604_s29  }
  0x29   : > { %p795_p0 = scmp.ge.s32.totalorder %s599_s17, 1 }
  0x2b   : > { %p172_p4 = pnand %p795_p0, %p171_p12 }
  0x2c   : > { %s177_s4 = sand.u32 (!%p172_p4), 1, %s583_s13  }
  0x2d   : > { %175 = sbr.rel (%p172_p4) target bundleno = 476 (0x1dc), region = 32  ;;  %s399_s8 = sshll.u32 (!%p172_p4), %s177_s4, 3 }
  0x2e   : > { %s178_s9 = scalar_lea.sflag (!%p172_p4), [#allocation4], %s177_s4  ;;  %s181_s10 = scalar_lea.vmem (!%p172_p4), [#allocation3], %s399_s8 }
  0x34   : > { %570 = dma.done.wait (%p673_p7), %s178_s9, 128  }
  0x35   : > { %572 = vsyncadd (%p673_p7), %s178_s9, 4294967168  ;;  %v411_v0 = vld [vmem:[%s181_s10] sm:$0xff]   ;;  %vm211_vm0 = vcmask 1043456   ;;  %v227_v11 = vld [vmem:[%s789_s1] sm:$0x3]  ;;  %vm249_vm1 = vcmask 1041408   ;;  %v232_v14 = vlaneseq }
  0x36   : > { %v412_v1 = vunpack.c.l.bf16 %v411_v0  ;;  %v413_v2 = vunpack.c.h.bf16 %v411_v0  ;;  %v605_v12 = vmov 0.0   ;;  %v251_v13 = vsel %vm249_vm1, %v227_v11, 0  ;;  %p401_p7 = scmp.ne.s32.totalorder %s591_s15, 0 }
  0x37   : > { %416 = vmatprep.subr.bf16.mxu0 %v605_v12  ;;  %vm606_vm2 = vmmov 0   ;;  %v233_v17 = vand.u32 127, %v232_v14  ;;  %v235_v18 = vshrl.u32 %v232_v14, 7  ;;  %vm242_vm3 = vcmask 1041409  }
  0x38   : > { %v207_v3 = vcombine.high %v412_v1, %v412_v1  ;;  %v212_v4 = vsel %vm211_vm0, %v412_v1, 0.0  ;;  %v208_v5 = vcombine.high %v413_v2, %v413_v2  ;;  %v217_v7 = vsel %vm211_vm0, %v413_v2, 0.0  ;;  %417 = vmatpush3.bf16.msra.mxu0 %v251_v13  ;;  %418 = vmatprep.mubr.msk.bf16.mxu0 %vm606_vm2, %v605_v12 }
  0x39   : > { %v236_v22 = vsub.s32 %v233_v17, %v235_v18  ;;  %vm245_vm4 = vcmask 31744  }
  0x3a   : > { %v213_v6 = vsel %vm211_vm0, %v207_v3, 0.0  ;;  %v218_v8 = vsel %vm211_vm0, %v208_v5, 0.0 }
  0x3b   : > { %v214_v9 = vadd.f32 %v213_v6, %v212_v4  ;;  %v219_v10 = vadd.f32 %v218_v8, %v217_v7 }
  0x3d   : > { %215 = vadd.xlane.f32.xlu0 %v214_v9 }
  0x41   : > { %220 = vadd.xlane.f32.xlu0 %v219_v10 }
  0xca   : > { %v216_v15 = vpop.xlane.xlu0 %215 }
  0xcb   : > { %v223_v16 = vmul.f32 0.00390625, %v216_v15 }
  0xcd   : > { %v225_v19 = vpack.c.bf16 %v223_v16, %v223_v16 }
  0xce   : > { %v221_v20 = vpop.xlane.xlu0 %220 }
  0xcf   : > { %v224_v21 = vmul.f32 0.00390625, %v221_v20  ;;  %v230_v23 = vunpack.c.l.b16 %v225_v19 }
  0xd1   : > { %v226_v24 = vpack.c.bf16 %v224_v21, %v224_v21  ;;  %v237_v26 = vrot.slane %v230_v23, %v236_v22 }
  0xd3   : > { %v231_v25 = vunpack.c.l.b16 %v226_v24 }
  0xd5   : > { %v241_v27 = vrot.slane %v231_v25, %v236_v22 }
  0xd7   : > { %v243_v28 = vsel %vm242_vm3, %v241_v27, %v237_v26 }
  0xd8   : > { %v244_v29 = vpack.c.b16 %v243_v28, %v243_v28 }
  0xda   : > { %419 = vmatmul.mubr.msk.bf16.vlgmr.msra.gmra.mrb[0].mxu0 %vm245_vm4, %v244_v29 }
 0x1aa   : > { %296 = sbr.rel (%p401_p7) target bundleno = 433 (0x1b1), region = 40 }
 0x1ad   : > { %v287_v30 = vpop.f32.mrb[0].mxu0 }
 0x1ae   : > { %v420_v31 = vpop.f32.mrb[1].mxu0  ;;  %297 = vst [vmem:[#allocation2] sm:$0x3] (!%p401_p7), %v287_v30 }
 0x1af   : > { %v290_v32 = vpop.f32.mrb[2].mxu0 }
 0x1b0   : > { %v421_v33 = vpop.f32.mrb[3].mxu0 }
 0x1b1 PF: > { %p402_p9 = scmp.le.s32.totalorder %s591_s15, 0 }
 0x1b3   : > { %301 = sbr.rel (%p402_p9) target bundleno = 442 (0x1ba), region = 44 }
 0x1b5   : > { %v302_v34 = vld [vmem:[#allocation2] sm:$0x3] (!%p402_p9) }
 0x1b6   : > { %v303_v35 = vmax.f32 (!%p402_p9), %v302_v34, %v287_v30 }
 0x1b8   : > { %304 = vst [vmem:[#allocation2] sm:$0x3] (!%p402_p9), %v303_v35 }
 0x1ba PF: > { %p403_p10 = scmp.ne.s32.totalorder %s591_s15, 4 }
 0x1bb   : > { %v404_v36 = vld [vmem:[%s790_s2] ss:$0 sm:$0xff] (!%p403_p10) }
 0x1bc   : > { %308 = sbr.rel (%p403_p10) target bundleno = 451 (0x1c3), region = 48 }
 0x1bf   : > { %v310_v37 = vld [vmem:[#allocation2] sm:$0x3] (!%p403_p10) }
 0x1c0   : > { %v317_v38 = vadd.f32 (!%p403_p10), %v404_v36, %v310_v37 }
 0x1c2   : > { %318 = vst [vmem:[#allocation6] sm:$0x3] (!%p403_p10), %v317_v38 }
 0x1c3 PF: > { %p744_p5 = scmp.eq.s32.totalorder %s392_s18, 4  ;;  %s607_s11 = smov [#allocation6]  }
 0x1c4   : > { %s328_s12 = sshll.u32 %s607_s11, 4  ;;  %s329_s12 = int_to_ptr.vmem [resolvable:$true] %s328_s12 }
 0x1c5   : > { %s519_s15 = scalar_lea.vmem %s329_s12, 32  ;;  %p526_p13 = scmp.lt.s32.totalorder %s329_s12, %s329_s12 }
 0x1c6   : > { %p520_p6 = scmp.ne.s32.totalorder %s329_s12, %s519_s15  ;;  %p527_p1 = scmp.lt.s32.totalorder %s519_s15, %s519_s15 }
 0x1c8   : > { %p521_p8 = pnand %p520_p6, %p744_p5  ;;  %p528_p2 = por %p527_p1, %p526_p13 }
 0x1ca   : > { %p522_p11 = pneg %p521_p8 }
 0x1cc   : > { %p529_p3 = pnand %p528_p2, %p522_p11 }
 0x1ce   : > { %532 = shalt.err (!%p529_p3)
}
 0x1cf   : > { %s533_s18 = scalar_lea.hbm %s791_s3, 32 }
 0x1d0   : > { %p534_p12 = scmp.ne.s32.totalorder %s791_s3, %s533_s18  ;;  %p539_p7 = scmp.lt.u32.totalorder %s533_s18, %s791_s3 }
 0x1d2   : > { %p535_p0 = pnand %p534_p12, %p744_p5 }
 0x1d4   : > { %p536_p4 = pneg %p535_p0 }
 0x1d6   : > { %p541_p9 = pnand %p539_p7, %p536_p4 }
 0x1d8   : > { %544 = shalt.err (!%p541_p9)
}
 0x1d9   : > { %425 = dma.vmem_to_hbm [thread:$0]  (%p744_p5), %s329_s12, 32, %s791_s3, [#allocation5]  }
 0x1da   : > { %574 = dma.done.wait (%p744_p5), [#allocation5], 32  }
 0x1db   : > { %576 = vsyncadd (%p744_p5), [#allocation5], 4294967264 }
 0x1dc PF: > { %s17_s17 = sadd.s32 1, %s599_s17   ;;  %s797_s12 = smov %s583_s13 }
 0x1dd   : > { %p14_p10 = scmp.ge.s32.totalorder %s17_s17, 7   ;;  %s798_s13 = smov %s587_s14 }
 0x1de   : > { %s799_s14 = smov %s679_s24  ;;  %s800_s15 = smov %s595_s16 }
 0x1df   : > { %s801_s16 = smov %s803_s19  ;;  %16 = sbr.rel (!%p14_p10) target bundleno = 5 (0x5), region = 82 }
 0x1e6   :  { %341 = vsyncpa [#allocation4], 1 }
 0x1e7   :  { %343 = vsyncpa [#allocation4 + $0x1], 1 }
 0x1e8   :  { %344 = vsyncpa [#allocation5], 1 }
 0x1e9   :  { %346 = vsyncpa [#allocation5 + $0x1], 1 }

</bundles_post_ra>
